<compile_context>
chip_gen: v6e
topology: v6e:2x2x1
jax: 0.10.0
libtpu: 0.0.40
codegen_flags: <defaults>
</compile_context>

<pallas_src>
import jax
import jax.numpy as jnp
from jax.experimental import pallas as pl
from jax.experimental.pallas import tpu as pltpu


# --------------------------------------------------------------------------------------
# Helpers
# --------------------------------------------------------------------------------------
def _round_hidden(hidden_dim: int, multiple_of: int = 256, ffn_dim_multiplier=None) -> int:
    hidden_dim = int(2 * hidden_dim / 3)
    if ffn_dim_multiplier is not None:
        hidden_dim = int(ffn_dim_multiplier * hidden_dim)
    return multiple_of * ((hidden_dim + multiple_of - 1) // multiple_of)


def _round_up(a: int, b: int) -> int:
    return (a + b - 1) // b * b


def _vmem_capacity_bytes() -> int:
    """Physical VMEM of the current TPU generation (128 MiB v5e/v6e, 64 MiB v7x per TC)."""
    try:
        cap = getattr(pltpu.get_tpu_info(), "vmem_capacity_bytes", None)
        if cap:
            return int(cap)
    except Exception:
        pass
    return 64 << 20  # conservative (v7x-sized) fallback


def _working_set_bytes(tile_m, tile_h, dim, w_isz, out_isz):
    """Per-grid-step VMEM footprint: double-buffered tiles + accumulator + intermediates."""
    x_tiles = 2 * tile_m * dim * w_isz                 # x tile, double-buffered
    w13_tiles = 2 * dim * (2 * tile_h) * w_isz         # fused W1|W3 tile, double-buffered
    w2t_tiles = 2 * tile_h * dim * w_isz               # W2^T tile, double-buffered
    out_tiles = 2 * tile_m * dim * out_isz             # output tile, double-buffered
    acc = tile_m * dim * 4                             # f32 accumulator
    inter = tile_m * (2 * tile_h) * 4 + tile_m * tile_h * w_isz  # h13 (f32) + gated (bf16)
    return x_tiles + w13_tiles + w2t_tiles + out_tiles + acc + inter


def _tile_h_candidates(hidden, gran):
    if hidden % gran != 0:
        return []
    return [th for th in range(hidden, gran - 1, -gran) if hidden % th == 0]


def _pick_tile_h(hidden, dim, tile_m, budget, w_isz, out_isz):
    """Largest hidden tile (256-aligned when hidden allows) whose working set fits budget."""
    grans = (256, 128) if hidden % 256 == 0 else (128,)
    for gran in grans:
        for th in _tile_h_candidates(hidden, gran):
            if _working_set_bytes(tile_m, th, dim, w_isz, out_isz) <= budget:
                return th
    return None


# --------------------------------------------------------------------------------------
# Kernel
# --------------------------------------------------------------------------------------
def _ffn_kernel(x_ref, w13_ref, w2t_ref, o_ref, acc_ref):
    # x_ref  : [tm, dim]    bf16
    # w13_ref: [dim, 2*th]  bf16  (per-hidden-tile [W1^T | W3^T])
    # w2t_ref: [th, dim]    bf16  (W2^T tile along its K axis)
    # o_ref  : [tm, dim]    out dtype (resident across the hidden reduction axis)
    # acc_ref: [tm, dim]    f32 scratch accumulator
    h = pl.program_id(1)
    th = w2t_ref.shape[0]

    # One fused MXU matmul for both gate projections of this hidden tile.
    h13 = jnp.dot(x_ref[...], w13_ref[...], preferred_element_type=jnp.float32)
    h1 = h13[:, :th]
    h3 = h13[:, th:]
    gated = (h1 * jax.nn.sigmoid(h1)) * h3              # f32: sigmoid on EUP, muls on VPU
    partial = jnp.dot(gated.astype(w2t_ref.dtype), w2t_ref[...],
                      preferred_element_type=jnp.float32)

    # No separate zero-init pass: the first reduction step writes the accumulator directly
    # (saves one full tm x dim f32 store + reload per m-tile).
    @pl.when(h == 0)
    def _():
        acc_ref[...] = partial

    @pl.when(h > 0)
    def _():
        acc_ref[...] += partial

    @pl.when(h == pl.num_programs(1) - 1)
    def _():
        o_ref[...] = acc_ref[...].astype(o_ref.dtype)


# --------------------------------------------------------------------------------------
# Weight preparation (hoisted: do this once per model, not per call)
# --------------------------------------------------------------------------------------
def prepare_ffn_weights(w1, w2, w3, tile_h, compute_dtype=jnp.bfloat16):
    """Transpose / cast / per-hidden-tile interleave of W1^T|W3^T. Call ONCE per model."""
    hidden, dim = w1.shape
    assert hidden % tile_h == 0
    nh = hidden // tile_h
    # TODO(synk): optional weight-only int8 (v5e/v6e) or fp8 (v7x) path to halve weight
    # HBM bytes in the re-stream regime; needs a per-tile dequant step in the kernel.
    w1t = jnp.asarray(w1).T.astype(compute_dtype).reshape(dim, nh, tile_h)
    w3t = jnp.asarray(w3).T.astype(compute_dtype).reshape(dim, nh, tile_h)
    # Per-tile layout [W1t_tile | W3t_tile] so one BlockSpec slice feeds one fused matmul.
    w13 = jnp.concatenate([w1t, w3t], axis=2).reshape(dim, nh * 2 * tile_h)
    w2t = jnp.asarray(w2).T.astype(compute_dtype)        # [hidden, dim]
    return w13, w2t


# --------------------------------------------------------------------------------------
# Public API
# --------------------------------------------------------------------------------------
def make_feed_forward(w1, w2, w3, *, compute_dtype=jnp.bfloat16,
                      tile_m=None, tile_h=None):
    """Prepare weights once and return `ffn(x) -> W2(silu(W1 x) * (W3 x))`."""
    hidden, dim = w1.shape
    if w3.shape != (hidden, dim) or w2.shape != (dim, hidden):
        raise ValueError("weight shape mismatch")

    w_isz = jnp.dtype(compute_dtype).itemsize
    vmem_cap = _vmem_capacity_bytes()
    vmem_limit_cap = (vmem_cap * 3) // 4          # ~96 MiB on v5e/v6e, ~48 MiB on v7x
    budget = int(vmem_limit_cap * 0.8)            # headroom for Mosaic internal scratch

    # Generation-aware prefill m-tile target: big enough to amortize the per-m-tile
    # weight re-stream (compute-bound needs ~680 bf16-flops/weight-byte on v6e, ~310 v7x).
    target_m = 1024 if vmem_cap >= (100 << 20) else 512
    if tile_m is not None:
        target_m = tile_m

    out_isz_worst = 4  # size the prep-time tile choice for the worst case (f32 output)

    if tile_h is None:
        tm_try = target_m
        th = _pick_tile_h(hidden, dim, tm_try, budget, w_isz, out_isz_worst)
        if tile_m is None:
            while th is None and tm_try > 16:
                tm_try = max(16, _round_up(tm_try // 2, 16))
                th = _pick_tile_h(hidden, dim, tm_try, budget, w_isz, out_isz_worst)
        if th is None:
            raise ValueError(
                f"FFN tile sizing failed: smallest tiles exceed the VMEM budget "
                f"(dim={dim}, hidden={hidden}, budget={budget} bytes)")
        tile_h = th
        target_m = tm_try
    else:
        if hidden % tile_h != 0:
            raise ValueError("tile_h must divide the hidden dimension")

    # Weight prep hoisted out of the per-call path.
    w13, w2t = prepare_ffn_weights(w1, w2, w3, tile_h, compute_dtype)
    n_h = hidden // tile_h
    th_fixed = tile_h

    def ffn(x):
        if x.shape[-1] != dim:
            raise ValueError("last dim of x must equal the model dim")
        lead_shape = x.shape[:-1]
        x2d = x.reshape(-1, dim)
        M = x2d.shape[0]
        out_isz = jnp.dtype(x.dtype).itemsize

        tm = target_m if tile_m is not None else min(target_m, _round_up(M, 16))
        if tile_m is None:
            while tm > 16 and _working_set_bytes(tm, th_fixed, dim, w_isz, out_isz) > budget:
                tm = max(16, _round_up(tm // 2, 16))
        ws = _working_set_bytes(tm, th_fixed, dim, w_isz, out_isz)
        if ws > vmem_limit_cap:
            raise ValueError(
                f"FFN tiles need {ws} bytes of VMEM, above the per-generation cap "
                f"{vmem_limit_cap}; pass smaller tile_m/tile_h")

        M_pad = _round_up(M, tm)
        if M_pad != M:
            x2d = jnp.pad(x2d, ((0, M_pad - M), (0, 0)))
        x_c = x2d.astype(compute_dtype)

        n_m = M_pad // tm
        # TODO(synk): v7x decode (n_m == 1) leaves the second TensorCore idle; split the
        # hidden reduction across cores with per-core partial accumulators to fix.

        vmem_limit = int(min(vmem_limit_cap, max(int(ws * 1.5), 8 << 20)))

        cost = pl.CostEstimate(
            flops=6 * M_pad * dim * hidden,               # 2 gate matmuls + down-proj
            transcendentals=M_pad * hidden,               # sigmoid
            bytes_accessed=(M_pad * dim * w_isz           # activations in
                            + n_m * 3 * hidden * dim * w_isz  # weights re-streamed per m-tile
                            + M_pad * dim * out_isz),     # output
        )

        out = pl.pallas_call(
            _ffn_kernel,
            out_shape=jax.ShapeDtypeStruct((M_pad, dim), x.dtype),
            grid_spec=pltpu.PrefetchScalarGridSpec(
                num_scalar_prefetch=0,
                grid=(n_m, n_h),                          # hidden (reduction) axis last
                in_specs=[
                    pl.BlockSpec((tm, dim), lambda i, h: (i, 0)),
                    # TODO(synk): if profiling shows an exposed DMA bubble when h wraps to 0,
                    # add pipeline_mode=pl.Buffered(3) here (after confirming VMEM headroom).
                    pl.BlockSpec((dim, 2 * th_fixed), lambda i, h: (0, h)),
                    pl.BlockSpec((th_fixed, dim), lambda i, h: (h, 0)),
                ],
                out_specs=pl.BlockSpec((tm, dim), lambda i, h: (i, 0)),
                scratch_shapes=[pltpu.VMEM((tm, dim), jnp.float32)],
            ),
            compiler_params=pltpu.CompilerParams(
                dimension_semantics=("parallel", "arbitrary"),
                vmem_limit_bytes=vmem_limit,
            ),
            cost_estimate=cost,
        )(x_c, w13, w2t)

        if M_pad != M:
            out = out[:M]
        return out.reshape(*lead_shape, dim)

    return ffn


def feed_forward(x, w1, w2, w3, **kwargs):
    """One-shot convenience wrapper. In a real model, build via make_feed_forward() once
    and cache the closure so weight prep is not re-done (and re-streamed) per call."""
    return make_feed_forward(w1, w2, w3, **kwargs)(x)


# --------------------------------------------------------------------------------------
# References
# --------------------------------------------------------------------------------------
def feed_forward_ref_f32(x, w1, w2, w3):
    h1 = x @ w1.T
    h3 = x @ w3.T
    return (h1 * jax.nn.sigmoid(h1) * h3) @ w2.T


def feed_forward_ref_bf16(x, w1, w2, w3):
    """f32 math over bf16-quantized operands: matches the kernel's cast points."""
    q = lambda a: a.astype(jnp.bfloat16).astype(jnp.float32)
    xb, w1b, w2b, w3b = q(x), q(w1), q(w2), q(w3)
    h1 = xb @ w1b.T
    h3 = xb @ w3b.T
    g = (h1 * jax.nn.sigmoid(h1)) * h3
    return q(g) @ w2b.T


# --------------------------------------------------------------------------------------
# Test
# --------------------------------------------------------------------------------------
if __name__ == "__main__":
    # FeedForwardRef(dim=128, hidden_dim=512): int(2*512/3)=341 -> round to 256 mult -> 512
    dim = 128
    hidden = _round_hidden(512, multiple_of=256)       # -> 512

    key = jax.random.PRNGKey(0)
    kx, k1, k2, k3, kx2 = jax.random.split(key, 5)

    # Deterministic "nn.Linear"-shaped weights (bias=False).
    w1 = jax.random.normal(k1, (hidden, dim), dtype=jnp.float32) * 0.02
    w2 = jax.random.normal(k2, (dim, hidden), dtype=jnp.float32) * 0.02
    w3 = jax.random.normal(k3, (hidden, dim), dtype=jnp.float32) * 0.02

    # Weight prep hoisted: build the kernel closure once, reuse for every call.
    ffn = make_feed_forward(w1, w2, w3)

    # Case 1: decode-ish shape (batch=2, seq=8).
    batch, seq = 2, 8
    x = jax.random.normal(kx, (batch, seq, dim), dtype=jnp.float32)
    y = jax.block_until_ready(ffn(x))
    assert y.shape == (batch, seq, dim)
    y_bf = feed_forward_ref_bf16(x, w1, w2, w3)
    assert jnp.allclose(y, y_bf, atol=1e-2, rtol=1e-2), "case1: mismatch vs bf16 reference"
    y_f32 = feed_forward_ref_f32(x, w1, w2, w3)
    assert jnp.allclose(y, y_f32, atol=5e-2, rtol=5e-2), "case1: mismatch vs f32 reference"

    # Case 2: force small tiles so the multi-step grid (parallel m axis + hidden reduction
    # with the accumulator carry / pl.when init-finalize paths) is exercised at small shapes.
    ffn_small = make_feed_forward(w1, w2, w3, tile_m=16, tile_h=256)
    x2 = jax.random.normal(kx2, (2, 40, dim), dtype=jnp.float32)   # M=80 -> 5 m-tiles, 2 h-tiles
    y2 = jax.block_until_ready(ffn_small(x2))
    assert y2.shape == (2, 40, dim)
    y2_bf = feed_forward_ref_bf16(x2, w1, w2, w3)
    assert jnp.allclose(y2, y2_bf, atol=1e-2, rtol=1e-2), "case2: mismatch vs bf16 reference"

    print("KERNEL_OK")
</pallas_src>

<mosaic_0001>
module attributes {stable_mosaic.version = 11 : i64} {
  func.func @_ffn_kernel(%arg0: i32, %arg1: i32, %arg2: memref<16x128xbf16, #tpu.memory_space<vmem>>, %arg3: memref<128x1024xbf16, #tpu.memory_space<vmem>>, %arg4: memref<512x128xbf16, #tpu.memory_space<vmem>>, %arg5: memref<16x128xf32, #tpu.memory_space<vmem>>, %arg6: memref<16x128xf32, #tpu.memory_space<vmem>>) attributes {dimension_semantics = [#tpu.dimension_semantics<parallel>, #tpu.dimension_semantics<arbitrary>], iteration_bounds = array<i64: 1, 1>, scalar_prefetch = 0 : i64, scratch_operands = 1 : i64, tpu.core_type = #tpu.core_type<tc>, window_params = [{transform_indices = @transform_0, window_bounds = array<i64: 16, 128>}, {transform_indices = @transform_1, window_bounds = array<i64: 128, 1024>}, {transform_indices = @transform_2, window_bounds = array<i64: 512, 128>}, {transform_indices = @transform_3, window_bounds = array<i64: 16, 128>}]} {
    %c0 = arith.constant 0 : index
    %c0_0 = arith.constant 0 : index
    %0 = vector.load %arg2[%c0, %c0_0] : memref<16x128xbf16, #tpu.memory_space<vmem>>, vector<16x128xbf16>
    %c0_1 = arith.constant 0 : index
    %c0_2 = arith.constant 0 : index
    %1 = vector.load %arg3[%c0_1, %c0_2] : memref<128x1024xbf16, #tpu.memory_space<vmem>>, vector<128x1024xbf16>
    %cst = arith.constant dense<0.000000e+00> : vector<16x1024xf32>
    %2 = tpu.matmul %0, %1, %cst {dimension_numbers = #tpu.dot_dimension_numbers<[1], [0], [0], [1], [0, 0, 1, 1], [], []>} : vector<16x128xbf16>, vector<128x1024xbf16>, vector<16x1024xf32> -> vector<16x1024xf32>
    %3 = vector.extract_strided_slice %2 {offsets = [0, 0], sizes = [16, 512], strides = [1, 1]} : vector<16x1024xf32> to vector<16x512xf32>
    %4 = vector.extract_strided_slice %2 {offsets = [0, 512], sizes = [16, 512], strides = [1, 1]} : vector<16x1024xf32> to vector<16x512xf32>
    %5 = arith.negf %3 : vector<16x512xf32>
    %6 = math.exp %5 : vector<16x512xf32>
    %cst_3 = arith.constant 1.000000e+00 : f32
    %7 = vector.broadcast %cst_3 : f32 to vector<16x512xf32>
    %8 = arith.addf %7, %6 : vector<16x512xf32>
    %9 = arith.divf %7, %8 : vector<16x512xf32>
    %10 = arith.mulf %3, %9 : vector<16x512xf32>
    %11 = arith.mulf %10, %4 : vector<16x512xf32>
    %12 = arith.truncf %11 : vector<16x512xf32> to vector<16x512xbf16>
    %c0_4 = arith.constant 0 : index
    %c0_5 = arith.constant 0 : index
    %13 = vector.load %arg4[%c0_4, %c0_5] : memref<512x128xbf16, #tpu.memory_space<vmem>>, vector<512x128xbf16>
    %cst_6 = arith.constant dense<0.000000e+00> : vector<16x128xf32>
    %14 = tpu.matmul %12, %13, %cst_6 {dimension_numbers = #tpu.dot_dimension_numbers<[1], [0], [0], [1], [0, 0, 1, 1], [], []>} : vector<16x512xbf16>, vector<512x128xbf16>, vector<16x128xf32> -> vector<16x128xf32>
    %c0_i32 = arith.constant 0 : i32
    %15 = arith.cmpi eq, %arg1, %c0_i32 : i32
    %16 = arith.extui %15 : i1 to i32
    %c0_i32_7 = arith.constant 0 : i32
    %17 = arith.cmpi ne, %16, %c0_i32_7 : i32
    scf.if %17 {
      %c0_12 = arith.constant 0 : index
      %c0_13 = arith.constant 0 : index
      %24 = vector.load %arg6[%c0_12, %c0_13] : memref<16x128xf32, #tpu.memory_space<vmem>>, vector<16x128xf32>
      tpu.vector_store %arg6[%c0_12, %c0_13], %14 {strides = array<i32>} : memref<16x128xf32, #tpu.memory_space<vmem>>, vector<16x128xf32>,
    } else {
    }
    %c0_i32_8 = arith.constant 0 : i32
    %18 = arith.cmpi sgt, %arg1, %c0_i32_8 : i32
    %19 = arith.extui %18 : i1 to i32
    %c0_i32_9 = arith.constant 0 : i32
    %20 = arith.cmpi ne, %19, %c0_i32_9 : i32
    scf.if %20 {
      %c0_12 = arith.constant 0 : index
      %c0_13 = arith.constant 0 : index
      %24 = vector.load %arg6[%c0_12, %c0_13] : memref<16x128xf32, #tpu.memory_space<vmem>>, vector<16x128xf32>
      %25 = arith.addf %24, %14 : vector<16x128xf32>
      %c0_14 = arith.constant 0 : index
      %c0_15 = arith.constant 0 : index
      %26 = vector.load %arg6[%c0_14, %c0_15] : memref<16x128xf32, #tpu.memory_space<vmem>>, vector<16x128xf32>
      tpu.vector_store %arg6[%c0_14, %c0_15], %25 {strides = array<i32>} : memref<16x128xf32, #tpu.memory_space<vmem>>, vector<16x128xf32>,
    } else {
    }
    %c0_i32_10 = arith.constant 0 : i32
    %21 = arith.cmpi eq, %arg1, %c0_i32_10 : i32
    %22 = arith.extui %21 : i1 to i32
    %c0_i32_11 = arith.constant 0 : i32
    %23 = arith.cmpi ne, %22, %c0_i32_11 : i32
    scf.if %23 {
      %c0_12 = arith.constant 0 : index
      %c0_13 = arith.constant 0 : index
      %24 = vector.load %arg6[%c0_12, %c0_13] : memref<16x128xf32, #tpu.memory_space<vmem>>, vector<16x128xf32>
      %c0_14 = arith.constant 0 : index
      %c0_15 = arith.constant 0 : index
      %25 = vector.load %arg5[%c0_14, %c0_15] : memref<16x128xf32, #tpu.memory_space<vmem>>, vector<16x128xf32>
      tpu.vector_store %arg5[%c0_14, %c0_15], %24 {strides = array<i32>} : memref<16x128xf32, #tpu.memory_space<vmem>>, vector<16x128xf32>,
    } else {
    }
    return
  }
  func.func @transform_0(%arg0: i32, %arg1: i32) -> (i32, i32) {
    %c0_i32 = arith.constant 0 : i32
    %c0_i32_0 = arith.constant 0 : i32
    return %arg0, %c0_i32 : i32, i32
  }
  func.func @transform_1(%arg0: i32, %arg1: i32) -> (i32, i32) {
    %c0_i32 = arith.constant 0 : i32
    %c0_i32_0 = arith.constant 0 : i32
    return %c0_i32, %arg1 : i32, i32
  }
  func.func @transform_2(%arg0: i32, %arg1: i32) -> (i32, i32) {
    %c0_i32 = arith.constant 0 : i32
    %c0_i32_0 = arith.constant 0 : i32
    return %arg1, %c0_i32 : i32, i32
  }
  func.func @transform_3(%arg0: i32, %arg1: i32) -> (i32, i32) {
    %c0_i32 = arith.constant 0 : i32
    %c0_i32_0 = arith.constant 0 : i32
    return %arg0, %c0_i32 : i32, i32
  }
}

</mosaic_0001>

<bundles_post_ra>
// kernel: tpu_custom_call.1
= control target key start
LH: loop header
LB: loop body
LE: loop exit
PB: predicated region body
PF: predicated region fallthrough
CT: control target
= control target key end

     0   :  { %8 = vsyncpa [#allocation4], 0  ;;  %s1440_s0 = inlined_call_operand.hbm [shape: bf16[16,128], index: 0, kind: input, shape index: {}]   ;;  %s1441_s1 = inlined_call_operand.hbm [shape: bf16[128,1024], index: 1, kind: input, shape index: {}]   ;;  %s1442_s2 = inlined_call_operand.hbm [shape: bf16[512,128], index: 2, kind: input, shape index: {}]   ;;  %s1443_s3 = inlined_call_operand.hbm [shape: f32[16,128], index: 3, kind: output, shape index: {}]  }
   0x1   :  { %9 = vsyncpa [#allocation7], 0 }
   0x2   :  { %10 = vsyncpa [#allocation5], 0  ;;  %s1379_s12 = smov [#allocation6]  }
   0x3   :  { %s28_s13 = sshll.u32 %s1379_s12, 4  ;;  %s29_s13 = int_to_ptr.vmem [resolvable:$true] %s28_s13 }
   0x4   :  { %s1301_s14 = scalar_lea.vmem %s29_s13, 8192  ;;  %p1306_p1 = scmp.lt.s32.totalorder %s29_s13, %s29_s13 }
   0x5   :  { %p1302_p0 = scmp.ne.s32.totalorder %s29_s13, %s1301_s14  ;;  %p1307_p2 = scmp.lt.s32.totalorder %s1301_s14, %s1301_s14 }
   0x7   :  { %p1308_p3 = por %p1307_p2, %p1306_p1 }
   0x9   :  { %p1309_p4 = pnand %p1308_p3, %p1302_p0 }
   0xb   :  { %1312 = shalt.err (!%p1309_p4)
}
   0xc   :  { %s1380_s15 = smov 512   ;;  %s1381_s16 = smov 32  }
   0xd   :  { %34 = dma.hbm_to_vmem [thread:$0]  %s1441_s1, 8192, %s29_s13, [#allocation7], %s1380_s15, %s1380_s15, %s1381_s16  }
   0xe   :  { %s1382_s19 = smov [#allocation3]  }
   0xf   :  { %s16_s20 = sshll.u32 %s1382_s19, 4  ;;  %s17_s20 = int_to_ptr.vmem [resolvable:$true] %s16_s20 }
  0x10   :  { %s1321_s21 = scalar_lea.vmem %s17_s20, 128  ;;  %p1326_p6 = scmp.lt.s32.totalorder %s17_s20, %s17_s20 }
  0x11   :  { %p1322_p5 = scmp.ne.s32.totalorder %s17_s20, %s1321_s21  ;;  %p1327_p7 = scmp.lt.s32.totalorder %s1321_s21, %s1321_s21 }
  0x13   :  { %p1328_p8 = por %p1327_p7, %p1326_p6 }
  0x15   :  { %p1329_p9 = pnand %p1328_p8, %p1322_p5 }
  0x17   :  { %1332 = shalt.err (!%p1329_p9)
}
  0x18   :  { %s1383_s22 = smov 64   ;;  %s1384_s23 = smov 4  }
  0x19   :  { %22 = dma.hbm_to_vmem [thread:$0]  %s1440_s0, 128, %s17_s20, [#allocation4], %s1383_s22, %s1383_s22, %s1384_s23  }
  0x1a   :  { %s1385_s26 = smov [#allocation8]  }
  0x1b   :  { %s40_s27 = sshll.u32 %s1385_s26, 4  ;;  %s41_s27 = int_to_ptr.vmem [resolvable:$true] %s40_s27 }
  0x1c   :  { %s1341_s1 = scalar_lea.vmem %s41_s27, 4096  ;;  %p1346_p11 = scmp.lt.s32.totalorder %s41_s27, %s41_s27 }
  0x1d   :  { %p1342_p10 = scmp.ne.s32.totalorder %s41_s27, %s1341_s1  ;;  %p1347_p12 = scmp.lt.s32.totalorder %s1341_s1, %s1341_s1 }
  0x1f   :  { %p1348_p13 = por %p1347_p12, %p1346_p11 }
  0x21   :  { %p1349_p0 = pnand %p1348_p13, %p1342_p10 }
  0x23   :  { %1352 = shalt.err (!%p1349_p0)
}
  0x24   :  { %46 = dma.hbm_to_vmem [thread:$0]  %s1442_s2, 4096, %s41_s27, [#allocation7], %s1383_s22, %s1383_s22, %s1384_s23  }
  0x25   :  { %1373 = dma.done.wait [#allocation4], 128  }
  0x26   :  { %1374 = vsyncadd [#allocation4], 4294967168 }
  0x27   :  { %1375 = dma.done.wait [#allocation7], 12288  }
  0x28   :  { %1376 = vsyncadd [#allocation7], 4294955008  ;;  %v1386_v0 = vmov 0   ;;  %v115_v1 = vld [vmem:[#allocation6 + $0x1c0] sm:$0xff]  ;;  %v116_v3 = vld [vmem:[#allocation6 + $0x1c8] sm:$0xff]  ;;  %s1387_s0 = smov [#allocation9]  }
  0x29   :  { %481 = vmatprep.mubr.bf16.mxu0 %v1386_v0  ;;  %524 = vmatprep.mubr.bf16.mxu1 %v1386_v0  ;;  %v119_v2 = vld [vmem:[#allocation6 + $0x1e0] sm:$0xff]  ;;  %v120_v5 = vld [vmem:[#allocation6 + $0x1e8] sm:$0xff]  ;;  %v117_v60 = vld [vmem:[#allocation6 + $0x1d0] sm:$0xff]  ;;  %s1055_s2 = sshll.u32 %s1387_s0, 4  ;;  %s1056_s2 = int_to_ptr.vmem [resolvable:$true] %s1055_s2 }
  0x2a   :  { %v1126_v4 = vcombine.high %v115_v1, %v119_v2  ;;  %v1125_v6 = vcombine.low %v115_v1, %v119_v2  ;;  %v107_v7 = vld [vmem:[#allocation6 + $0x180] sm:$0xff]  ;;  %v1128_v9 = vcombine.high %v116_v3, %v120_v5  ;;  %v1127_v10 = vcombine.low %v116_v3, %v120_v5  ;;  %v108_v12 = vld [vmem:[#allocation6 + $0x188] sm:$0xff]  ;;  %v121_v61 = vld [vmem:[#allocation6 + $0x1f0] sm:$0xff]  ;;  %s1353_s30 = scalar_lea.vmem %s1056_s2, 256  ;;  %p1358_p2 = scmp.lt.s32.totalorder %s1056_s2, %s1056_s2 }
  0x2b   :  { %v111_v8 = vld [vmem:[#allocation6 + $0x1a0] sm:$0xff]  ;;  %v112_v13 = vld [vmem:[#allocation6 + $0x1a8] sm:$0xff]  ;;  %v118_v1 = vld [vmem:[#allocation6 + $0x1d8] sm:$0xff]  ;;  %p1354_p1 = scmp.ne.s32.totalorder %s1056_s2, %s1353_s30  ;;  %p1359_p3 = scmp.lt.s32.totalorder %s1353_s30, %s1353_s30 }
  0x2c   :  { %v1118_v11 = vcombine.high %v107_v7, %v111_v8  ;;  %v99_v14 = vld [vmem:[#allocation6 + $0x140] sm:$0xff]  ;;  %449 = vmatprep.subr.bf16.mxu0 %v1126_v4  ;;  %v1120_v15 = vcombine.high %v108_v12, %v112_v13  ;;  %v100_v17 = vld [vmem:[#allocation6 + $0x148] sm:$0xff]  ;;  %492 = vmatprep.subr.bf16.mxu1 %v1128_v9  ;;  %v1117_v19 = vcombine.low %v107_v7, %v111_v8  ;;  %v122_v2 = vld [vmem:[#allocation6 + $0x1f8] sm:$0xff] }
  0x2d   :  { %v103_v16 = vld [vmem:[#allocation6 + $0x160] sm:$0xff]  ;;  %v104_v18 = vld [vmem:[#allocation6 + $0x168] sm:$0xff]  ;;  %450 = vmatpush1.bf16.msra.mxu0 %v1125_v6  ;;  %493 = vmatpush1.bf16.msra.mxu1 %v1127_v10  ;;  %v1119_v20 = vcombine.low %v108_v12, %v112_v13  ;;  %v109_v5 = vld [vmem:[#allocation6 + $0x190] sm:$0xff]  ;;  %v1130_v9 = vcombine.high %v117_v60, %v121_v61  ;;  %v1132_v12 = vcombine.high %v118_v1, %v122_v2  ;;  %p1360_p4 = por %p1359_p3, %p1358_p2 }
  0x2e   :  { %451 = vmatprep.subr.bf16.mxu0 %v1118_v11  ;;  %v1110_v21 = vcombine.high %v99_v14, %v103_v16  ;;  %494 = vmatprep.subr.bf16.mxu1 %v1120_v15  ;;  %v1112_v22 = vcombine.high %v100_v17, %v104_v18  ;;  %v91_v23 = vld [vmem:[#allocation6 + $0x100] sm:$0xff]  ;;  %v92_v25 = vld [vmem:[#allocation6 + $0x108] sm:$0xff]  ;;  %v1109_v27 = vcombine.low %v99_v14, %v103_v16  ;;  %v113_v6 = vld [vmem:[#allocation6 + $0x1b0] sm:$0xff] }
  0x2f   :  { %v95_v24 = vld [vmem:[#allocation6 + $0x120] sm:$0xff]  ;;  %v96_v26 = vld [vmem:[#allocation6 + $0x128] sm:$0xff]  ;;  %v1111_v28 = vcombine.low %v100_v17, %v104_v18  ;;  %v1421_v8 = vld [vmem:[#allocation3] sm:$0xff]   ;;  %v1129_v13 = vcombine.low %v117_v60, %v121_v61  ;;  %v1131_v16 = vcombine.low %v118_v1, %v122_v2  ;;  %v1122_v17 = vcombine.high %v109_v5, %v113_v6  ;;  %p1361_p5 = pnand %p1360_p4, %p1354_p1 }
  0x30   :  { %v1102_v29 = vcombine.high %v91_v23, %v95_v24  ;;  %v1104_v30 = vcombine.high %v92_v25, %v96_v26  ;;  %v83_v31 = vld [vmem:[#allocation6 + $0xc0] sm:$0xff]  ;;  %v84_v33 = vld [vmem:[#allocation6 + $0xc8] sm:$0xff]  ;;  %v1101_v35 = vcombine.low %v91_v23, %v95_v24  ;;  %v1103_v36 = vcombine.low %v92_v25, %v96_v26  ;;  %v110_v10 = vld [vmem:[#allocation6 + $0x198] sm:$0xff] }
  0x31   :  { %452 = vmatpush1.bf16.msra.mxu0 %v1117_v19  ;;  %495 = vmatpush1.bf16.msra.mxu1 %v1119_v20  ;;  %v87_v32 = vld [vmem:[#allocation6 + $0xe0] sm:$0xff]  ;;  %v88_v34 = vld [vmem:[#allocation6 + $0xe8] sm:$0xff]  ;;  %v114_v11 = vld [vmem:[#allocation6 + $0x1b8] sm:$0xff] }
  0x32   :  { %453 = vmatprep.subr.bf16.mxu0 %v1110_v21  ;;  %496 = vmatprep.subr.bf16.mxu1 %v1112_v22  ;;  %v1094_v37 = vcombine.high %v83_v31, %v87_v32  ;;  %v1096_v38 = vcombine.high %v84_v33, %v88_v34  ;;  %v75_v39 = vld [vmem:[#allocation6 + $0x80] sm:$0xff]  ;;  %v76_v41 = vld [vmem:[#allocation6 + $0x88] sm:$0xff]  ;;  %v1093_v43 = vcombine.low %v83_v31, %v87_v32  ;;  %v101_v14 = vld [vmem:[#allocation6 + $0x150] sm:$0xff] }
  0x33   :  { %v79_v40 = vld [vmem:[#allocation6 + $0xa0] sm:$0xff]  ;;  %v80_v42 = vld [vmem:[#allocation6 + $0xa8] sm:$0xff]  ;;  %v1095_v44 = vcombine.low %v84_v33, %v88_v34  ;;  %v105_v15 = vld [vmem:[#allocation6 + $0x170] sm:$0xff]  ;;  %v1124_v20 = vcombine.high %v110_v10, %v114_v11  ;;  %v1121_v21 = vcombine.low %v109_v5, %v113_v6  ;;  %v1123_v24 = vcombine.low %v110_v10, %v114_v11 }
  0x34   :  { %v1086_v45 = vcombine.high %v75_v39, %v79_v40  ;;  %v1088_v46 = vcombine.high %v76_v41, %v80_v42  ;;  %v67_v47 = vld [vmem:[#allocation6 + $0x40] sm:$0xff]  ;;  %v68_v49 = vld [vmem:[#allocation6 + $0x48] sm:$0xff]  ;;  %v1085_v51 = vcombine.low %v75_v39, %v79_v40  ;;  %v1087_v52 = vcombine.low %v76_v41, %v80_v42  ;;  %v102_v18 = vld [vmem:[#allocation6 + $0x158] sm:$0xff] }
  0x35   :  { %454 = vmatpush1.bf16.msra.mxu0 %v1109_v27  ;;  %497 = vmatpush1.bf16.msra.mxu1 %v1111_v28  ;;  %v71_v48 = vld [vmem:[#allocation6 + $0x60] sm:$0xff]  ;;  %v72_v50 = vld [vmem:[#allocation6 + $0x68] sm:$0xff]  ;;  %v106_v19 = vld [vmem:[#allocation6 + $0x178] sm:$0xff]  ;;  %v1114_v25 = vcombine.high %v101_v14, %v105_v15 }
  0x36   :  { %455 = vmatprep.subr.bf16.mxu0 %v1102_v29  ;;  %498 = vmatprep.subr.bf16.mxu1 %v1104_v30  ;;  %v1078_v53 = vcombine.high %v67_v47, %v71_v48  ;;  %v59_v54 = vld [vmem:[#allocation6] sm:$0xff]  ;;  %v60_v56 = vld [vmem:[#allocation6 + $0x8] sm:$0xff]  ;;  %v1080_v57 = vcombine.high %v68_v49, %v72_v50  ;;  %v1077_v59 = vcombine.low %v67_v47, %v71_v48  ;;  %v93_v22 = vld [vmem:[#allocation6 + $0x110] sm:$0xff] }
  0x37   :  { %v63_v55 = vld [vmem:[#allocation6 + $0x20] sm:$0xff]  ;;  %v64_v58 = vld [vmem:[#allocation6 + $0x28] sm:$0xff]  ;;  %v1079_v62 = vcombine.low %v68_v49, %v72_v50  ;;  %v97_v23 = vld [vmem:[#allocation6 + $0x130] sm:$0xff]  ;;  %v1116_v28 = vcombine.high %v102_v18, %v106_v19  ;;  %v1113_v29 = vcombine.low %v101_v14, %v105_v15  ;;  %v1115_v32 = vcombine.low %v102_v18, %v106_v19 }
  0x38   :  { %v1070_v63 = vcombine.high %v59_v54, %v63_v55  ;;  %v1072_v3 = vcombine.high %v60_v56, %v64_v58  ;;  %v1069_v4 = vcombine.low %v59_v54, %v63_v55  ;;  %v1071_v7 = vcombine.low %v60_v56, %v64_v58  ;;  %v94_v26 = vld [vmem:[#allocation6 + $0x118] sm:$0xff]  ;;  %v85_v30 = vld [vmem:[#allocation6 + $0xd0] sm:$0xff]  ;;  %v1239_v14 = vld [vmem:[#allocation8 + $0x28] sm:$0xff]  }
  0x39   :  { %456 = vmatpush1.bf16.msra.mxu0 %v1101_v35  ;;  %499 = vmatpush1.bf16.msra.mxu1 %v1103_v36  ;;  %v98_v27 = vld [vmem:[#allocation6 + $0x138] sm:$0xff]  ;;  %v89_v31 = vld [vmem:[#allocation6 + $0xf0] sm:$0xff]  ;;  %v1106_v33 = vcombine.high %v93_v22, %v97_v23  ;;  %v1241_v15 = vld [vmem:[#allocation8 + $0x60] sm:$0xff]  }
  0x3a   :  { %457 = vmatprep.subr.bf16.mxu0 %v1094_v37  ;;  %500 = vmatprep.subr.bf16.mxu1 %v1096_v38  ;;  %v86_v34 = vld [vmem:[#allocation6 + $0xd8] sm:$0xff]  ;;  %v1108_v35 = vcombine.high %v94_v26, %v98_v27  ;;  %v1105_v37 = vcombine.low %v93_v22, %v97_v23  ;;  %v1107_v38 = vcombine.low %v94_v26, %v98_v27  ;;  %v77_v40 = vld [vmem:[#allocation6 + $0x90] sm:$0xff]  ;;  %v1244_v18 = vld [vmem:[#allocation8 + $0xa0] sm:$0xff]  }
  0x3b   :  { %v90_v36 = vld [vmem:[#allocation6 + $0xf8] sm:$0xff]  ;;  %v1098_v39 = vcombine.high %v85_v30, %v89_v31  ;;  %v81_v41 = vld [vmem:[#allocation6 + $0xb0] sm:$0xff]  ;;  %v1253_v27 = vld [vmem:[#allocation8 + $0x48] sm:$0xff]  }
  0x3c   :  { %v78_v42 = vld [vmem:[#allocation6 + $0x98] sm:$0xff]  ;;  %v69_v48 = vld [vmem:[#allocation6 + $0x50] sm:$0xff] }
  0x3d   :  { %458 = vmatpush1.bf16.msra.mxu0 %v1093_v43  ;;  %501 = vmatpush1.bf16.msra.mxu1 %v1095_v44  ;;  %v82_v43 = vld [vmem:[#allocation6 + $0xb8] sm:$0xff]  ;;  %v1097_v44 = vcombine.low %v85_v30, %v89_v31  ;;  %v73_v49 = vld [vmem:[#allocation6 + $0x70] sm:$0xff]  ;;  %v1256_v30 = vld [vmem:[#allocation8 + $0x88] sm:$0xff]  }
  0x3e   :  { %459 = vmatprep.subr.bf16.mxu0 %v1086_v45  ;;  %502 = vmatprep.subr.bf16.mxu1 %v1088_v46  ;;  %v1099_v45 = vcombine.low %v86_v34, %v90_v36  ;;  %v1090_v46 = vcombine.high %v77_v40, %v81_v41  ;;  %v1092_v47 = vcombine.high %v78_v42, %v82_v43  ;;  %v70_v50 = vld [vmem:[#allocation6 + $0x58] sm:$0xff]  ;;  %v61_v56 = vld [vmem:[#allocation6 + $0x10] sm:$0xff]  ;;  %v1257_v31 = vld [vmem:[#allocation8 + $0x40] sm:$0xff]  }
  0x3f   :  { %v1082_v54 = vcombine.high %v69_v48, %v73_v49  ;;  %v62_v58 = vld [vmem:[#allocation6 + $0x18] sm:$0xff]  ;;  %v1081_v60 = vcombine.low %v69_v48, %v73_v49  ;;  %v1235_v10 = vld [vmem:[#allocation8 + $0x30] sm:$0xff]  }
  0x40   :  { %v1231_v5 = vld [vmem:[#allocation8 + $0x38] sm:$0xff]   ;;  %v1236_v11 = vld [vmem:[#allocation8 + $0xb0] sm:$0xff]  }
  0x41   :  { %460 = vmatpush1.bf16.msra.mxu0 %v1085_v51  ;;  %503 = vmatpush1.bf16.msra.mxu1 %v1087_v52  ;;  %v74_v51 = vld [vmem:[#allocation6 + $0x78] sm:$0xff]  ;;  %v1089_v52 = vcombine.low %v77_v40, %v81_v41  ;;  %v1249_v23 = vld [vmem:[#allocation8 + $0x50] sm:$0xff]  }
  0x42   :  { %461 = vmatprep.subr.bf16.mxu0 %v1078_v53  ;;  %504 = vmatprep.subr.bf16.mxu1 %v1080_v57  ;;  %v1091_v53 = vcombine.low %v78_v42, %v82_v43  ;;  %v1084_v55 = vcombine.high %v70_v50, %v74_v51  ;;  %v65_v57 = vld [vmem:[#allocation6 + $0x30] sm:$0xff]  ;;  %v1083_v61 = vcombine.low %v70_v50, %v74_v51  ;;  %v1232_v6 = vld [vmem:[#allocation8 + $0xb8] sm:$0xff]  }
  0x43   :  { %v1073_v1 = vcombine.low %v61_v56, %v65_v57  ;;  %v1245_v19 = vld [vmem:[#allocation8 + $0x58] sm:$0xff]   ;;  %v1252_v26 = vld [vmem:[#allocation8 + $0x90] sm:$0xff]  }
  0x44   :  { %v1248_v22 = vld [vmem:[#allocation8 + $0x98] sm:$0xff]  }
  0x45   :  { %462 = vmatpush1.bf16.msra.mxu0 %v1077_v59  ;;  %505 = vmatpush1.bf16.msra.mxu1 %v1079_v62  ;;  %v66_v59 = vld [vmem:[#allocation6 + $0x38] sm:$0xff]  ;;  %v1074_v62 = vcombine.high %v61_v56, %v65_v57 }
  0x46   :  { %463 = vmatprep.subr.bf16.mxu0 %v1070_v63  ;;  %506 = vmatprep.subr.bf16.mxu1 %v1072_v3  ;;  %v1076_v63 = vcombine.high %v62_v58, %v66_v59  ;;  %v1075_v2 = vcombine.low %v62_v58, %v66_v59  ;;  %v1229_v3 = vld [vmem:[#allocation8 + $0x78] sm:$0xff]  }
  0x49   :  { %464 = vmatpush1.bf16.msra.mxu0 %v1069_v4  ;;  %507 = vmatpush1.bf16.msra.mxu1 %v1071_v7  ;;  %v1230_v4 = vld [vmem:[#allocation8 + $0xf8] sm:$0xff]   ;;  %v1233_v7 = vld [vmem:[#allocation8 + $0x70] sm:$0xff]  }
  0x4a   :  { %535 = vmatprep.subr.bf16.mxu0 %v1130_v9  ;;  %578 = vmatprep.subr.bf16.mxu1 %v1132_v12  ;;  %v1234_v9 = vld [vmem:[#allocation8 + $0xf0] sm:$0xff]   ;;  %v1237_v12 = vld [vmem:[#allocation8 + $0x68] sm:$0xff]  }
  0x4c   :  { %482 = vmatmul.mubr.bf16.vlgmr.msra.gmra.mxu0 %v1421_v8  ;;  %525 = vmatmul.mubr.bf16.vlgmr.msra.gmra.mxu1 %v1421_v8 }
  0x4d   :  { %536 = vmatpush1.bf16.msra.mxu0 %v1129_v13  ;;  %579 = vmatpush1.bf16.msra.mxu1 %v1131_v16  ;;  %v1238_v13 = vld [vmem:[#allocation8 + $0xe8] sm:$0xff]   ;;  %v1242_v16 = vld [vmem:[#allocation8 + $0xe0] sm:$0xff]  }
  0x4e   :  { %537 = vmatprep.subr.bf16.mxu0 %v1122_v17  ;;  %580 = vmatprep.subr.bf16.mxu1 %v1124_v20  ;;  %v1243_v17 = vld [vmem:[#allocation8 + $0x20] sm:$0xff]   ;;  %v1246_v20 = vld [vmem:[#allocation8 + $0xd8] sm:$0xff]  }
  0x4f   :  { %567 = vmatprep.mubr.bf16.mxu0 %v1386_v0  ;;  %610 = vmatprep.mubr.bf16.mxu1 %v1386_v0  ;;  %v1100_v0 = vcombine.high %v86_v34, %v90_v36  ;;  %v1260_v34 = vld [vmem:[#allocation8 + $0x80] sm:$0xff]  }
  0x51   :  { %538 = vmatpush1.bf16.msra.mxu0 %v1121_v21  ;;  %581 = vmatpush1.bf16.msra.mxu1 %v1123_v24  ;;  %v1247_v21 = vld [vmem:[#allocation8 + $0x18] sm:$0xff]   ;;  %v1250_v24 = vld [vmem:[#allocation8 + $0xd0] sm:$0xff]  }
  0x52   :  { %539 = vmatprep.subr.bf16.mxu0 %v1114_v25  ;;  %582 = vmatprep.subr.bf16.mxu1 %v1116_v28  ;;  %v1251_v25 = vld [vmem:[#allocation8 + $0x10] sm:$0xff]   ;;  %v1254_v28 = vld [vmem:[#allocation8 + $0xc8] sm:$0xff]  }
  0x55   :  { %540 = vmatpush1.bf16.msra.mxu0 %v1113_v29  ;;  %583 = vmatpush1.bf16.msra.mxu1 %v1115_v32  ;;  %v1255_v29 = vld [vmem:[#allocation8 + $0x8] sm:$0xff]   ;;  %v1258_v32 = vld [vmem:[#allocation8 + $0xc0] sm:$0xff]  }
  0x56   :  { %541 = vmatprep.subr.bf16.mxu0 %v1106_v33  ;;  %584 = vmatprep.subr.bf16.mxu1 %v1108_v35  ;;  %v1259_v33 = vld [vmem:[#allocation8] sm:$0xff]  }
  0x59   :  { %542 = vmatpush1.bf16.msra.mxu0 %v1105_v37  ;;  %585 = vmatpush1.bf16.msra.mxu1 %v1107_v38 }
  0x5a   :  { %543 = vmatprep.subr.bf16.mxu0 %v1098_v39  ;;  %586 = vmatprep.subr.bf16.mxu1 %v1100_v0 }
  0x5d   :  { %544 = vmatpush1.bf16.msra.mxu0 %v1097_v44  ;;  %587 = vmatpush1.bf16.msra.mxu1 %v1099_v45 }
  0x5e   :  { %545 = vmatprep.subr.bf16.mxu0 %v1090_v46  ;;  %588 = vmatprep.subr.bf16.mxu1 %v1092_v47 }
  0x61   :  { %546 = vmatpush1.bf16.msra.mxu0 %v1089_v52  ;;  %589 = vmatpush1.bf16.msra.mxu1 %v1091_v53 }
  0x62   :  { %547 = vmatprep.subr.bf16.mxu0 %v1082_v54  ;;  %590 = vmatprep.subr.bf16.mxu1 %v1084_v55 }
  0x65   :  { %548 = vmatpush1.bf16.msra.mxu0 %v1081_v60  ;;  %591 = vmatpush1.bf16.msra.mxu1 %v1083_v61 }
  0x66   :  { %549 = vmatprep.subr.bf16.mxu0 %v1074_v62  ;;  %592 = vmatprep.subr.bf16.mxu1 %v1076_v63 }
  0x69   :  { %550 = vmatpush1.bf16.msra.mxu0 %v1073_v1  ;;  %593 = vmatpush1.bf16.msra.mxu1 %v1075_v2 }
  0x6a   :  { %1173 = vmatprep.subr.bf16.mxu0 %v1229_v3  ;;  %1195 = vmatprep.subr.bf16.mxu1 %v1230_v4 }
  0x6c   :  { %568 = vmatmul.mubr.bf16.vlgmr.msra.gmra.mxu0 %v1421_v8  ;;  %611 = vmatmul.mubr.bf16.vlgmr.msra.gmra.mxu1 %v1421_v8  ;;  %v1240_v8 = vld [vmem:[#allocation8 + $0xa8] sm:$0xff]  }
  0x6d   :  { %1174 = vmatpush3.bf16.msra.mxu0 %v1231_v5  ;;  %1196 = vmatpush3.bf16.msra.mxu1 %v1232_v6 }
  0x6e   :  { %1175 = vmatprep.subr.bf16.mxu0 %v1233_v7  ;;  %1197 = vmatprep.subr.bf16.mxu1 %v1234_v9 }
  0x71   :  { %1176 = vmatpush3.bf16.msra.mxu0 %v1235_v10  ;;  %1198 = vmatpush3.bf16.msra.mxu1 %v1236_v11 }
  0x72   :  { %1177 = vmatprep.subr.bf16.mxu0 %v1237_v12  ;;  %1199 = vmatprep.subr.bf16.mxu1 %v1238_v13 }
  0x75   :  { %1178 = vmatpush3.bf16.msra.mxu0 %v1239_v14  ;;  %1200 = vmatpush3.bf16.msra.mxu1 %v1240_v8 }
  0x76   :  { %1179 = vmatprep.subr.bf16.mxu0 %v1241_v15  ;;  %1201 = vmatprep.subr.bf16.mxu1 %v1242_v16 }
  0x79   :  { %1180 = vmatpush3.bf16.msra.mxu0 %v1243_v17  ;;  %1202 = vmatpush3.bf16.msra.mxu1 %v1244_v18 }
  0x7a   :  { %1181 = vmatprep.subr.bf16.mxu0 %v1245_v19  ;;  %1203 = vmatprep.subr.bf16.mxu1 %v1246_v20 }
  0x7d   :  { %1182 = vmatpush3.bf16.msra.mxu0 %v1247_v21  ;;  %1204 = vmatpush3.bf16.msra.mxu1 %v1248_v22 }
  0x7e   :  { %1183 = vmatprep.subr.bf16.mxu0 %v1249_v23  ;;  %1205 = vmatprep.subr.bf16.mxu1 %v1250_v24 }
  0x81   :  { %1184 = vmatpush3.bf16.msra.mxu0 %v1251_v25  ;;  %1206 = vmatpush3.bf16.msra.mxu1 %v1252_v26 }
  0x82   :  { %1185 = vmatprep.subr.bf16.mxu0 %v1253_v27  ;;  %1207 = vmatprep.subr.bf16.mxu1 %v1254_v28 }
  0x85   :  { %1186 = vmatpush3.bf16.msra.mxu0 %v1255_v29  ;;  %1208 = vmatpush3.bf16.msra.mxu1 %v1256_v30 }
  0x86   :  { %1187 = vmatprep.subr.bf16.mxu0 %v1257_v31  ;;  %1209 = vmatprep.subr.bf16.mxu1 %v1258_v32 }
  0x89   :  { %1188 = vmatpush3.bf16.msra.mxu0 %v1259_v33  ;;  %1210 = vmatpush3.bf16.msra.mxu1 %v1260_v34 }
 0x10c   :  { %v1429_v35 = vpop.f32.mrf.mxu0  ;;  %v1432_v37 = vpop.f32.mrf.mxu1 }
 0x10d   :  { %v1133_v36 = vmul.f32 -1.442695, %v1429_v35  ;;  %v1135_v38 = vmul.f32 -1.442695, %v1432_v37 }
 0x10e   :  { %v485_v39 = vpop.f32.mrf.mxu0  ;;  %v528_v40 = vpop.f32.mrf.mxu1 }
 0x10f   :  { %1261 = vpow2.f32 %v1133_v36  ;;  %v1134_v0 = vmul.f32 -1.442695, %v485_v39  ;;  %v1136_v41 = vmul.f32 -1.442695, %v528_v40 }
 0x110   :  { %1263 = vpow2.f32 %v1135_v38  ;;  %v487_v42 = vpop.f32.mrf.mxu0  ;;  %v530_v44 = vpop.f32.mrf.mxu1 }
 0x111   :  { %1265 = vpow2.f32 %v1134_v0  ;;  %v1137_v43 = vmul.f32 -1.442695, %v487_v42  ;;  %v1139_v45 = vmul.f32 -1.442695, %v530_v44 }
 0x112   :  { %1267 = vpow2.f32 %v1136_v41  ;;  %v489_v46 = vpop.f32.mrf.mxu0  ;;  %v532_v48 = vpop.f32.mrf.mxu1 }
 0x113   :  { %1269 = vpow2.f32 %v1137_v43  ;;  %v1138_v47 = vmul.f32 -1.442695, %v489_v46  ;;  %v1140_v49 = vmul.f32 -1.442695, %v532_v48 }
 0x114   :  { %1271 = vpow2.f32 %v1139_v45 }
 0x115   :  { %1273 = vpow2.f32 %v1138_v47 }
 0x116   :  { %1275 = vpow2.f32 %v1140_v49 }
 0x11c   :  { %v1262_v50 = vpop.eup %1261 }
 0x11d   :  { %v1264_v51 = vpop.eup %1263  ;;  %v645_v52 = vadd.f32 1.0, %v1262_v50 }
 0x11e   :  { %v1266_v53 = vpop.eup %1265  ;;  %v647_v54 = vadd.f32 1.0, %v1264_v51 }
 0x11f   :  { %v1268_v55 = vpop.eup %1267  ;;  %1277 = vrcp.f32 %v645_v52  ;;  %v646_v56 = vadd.f32 1.0, %v1266_v53 }
 0x120   :  { %v1270_v57 = vpop.eup %1269  ;;  %1279 = vrcp.f32 %v647_v54  ;;  %v648_v58 = vadd.f32 1.0, %v1268_v55 }
 0x121   :  { %v1272_v59 = vpop.eup %1271  ;;  %1281 = vrcp.f32 %v646_v56  ;;  %v649_v60 = vadd.f32 1.0, %v1270_v57 }
 0x122   :  { %v1274_v61 = vpop.eup %1273  ;;  %1283 = vrcp.f32 %v648_v58  ;;  %v651_v62 = vadd.f32 1.0, %v1272_v59 }
 0x123   :  { %v1276_v63 = vpop.eup %1275  ;;  %1285 = vrcp.f32 %v649_v60  ;;  %v650_v1 = vadd.f32 1.0, %v1274_v61 }
 0x124   :  { %1287 = vrcp.f32 %v651_v62  ;;  %v652_v2 = vadd.f32 1.0, %v1276_v63 }
 0x125   :  { %1289 = vrcp.f32 %v650_v1 }
 0x126   :  { %1291 = vrcp.f32 %v652_v2 }
 0x12c   :  { %v1278_v3 = vpop.eup %1277  ;;  %v569_v4 = vpop.f32.mrf.mxu0 }
 0x12d   :  { %v1280_v5 = vpop.eup %1279  ;;  %v612_v6 = vpop.f32.mrf.mxu1  ;;  %v669_v18 = vmul.f32 %v1278_v3, %v1429_v35 }
 0x12e   :  { %v1282_v7 = vpop.eup %1281  ;;  %v571_v9 = vpop.f32.mrf.mxu0  ;;  %v671_v22 = vmul.f32 %v1280_v5, %v1432_v37 }
 0x12f   :  { %v1284_v10 = vpop.eup %1283  ;;  %v614_v11 = vpop.f32.mrf.mxu1  ;;  %v670_v8 = vmul.f32 %v1282_v7, %v485_v39  ;;  %v677_v31 = vmul.f32 %v669_v18, %v569_v4 }
 0x130   :  { %v1286_v12 = vpop.eup %1285  ;;  %v573_v13 = vpop.f32.mrf.mxu0  ;;  %v672_v19 = vmul.f32 %v1284_v10, %v528_v40  ;;  %v679_v34 = vmul.f32 %v671_v22, %v612_v6 }
 0x131   :  { %v1288_v14 = vpop.eup %1287  ;;  %v673_v15 = vmul.f32 %v1286_v12, %v487_v42  ;;  %v616_v16 = vpop.f32.mrf.mxu1  ;;  %v678_v27 = vmul.f32 %v670_v8, %v571_v9 }
 0x132   :  { %v1290_v17 = vpop.eup %1289  ;;  %v675_v20 = vmul.f32 %v1288_v14, %v530_v44  ;;  %v575_v26 = vpop.f32.mrf.mxu0  ;;  %v680_v32 = vmul.f32 %v672_v19, %v614_v11 }
 0x133   :  { %v1292_v21 = vpop.eup %1291  ;;  %v674_v23 = vmul.f32 %v1290_v17, %v489_v46  ;;  %v681_v25 = vmul.f32 %v673_v15, %v573_v13  ;;  %v618_v30 = vpop.f32.mrf.mxu1 }
 0x134   :  { %v676_v24 = vmul.f32 %v1292_v21, %v532_v48  ;;  %v683_v28 = vmul.f32 %v675_v20, %v616_v16 }
 0x135   :  { %v682_v29 = vmul.f32 %v674_v23, %v575_v26  ;;  %v685_v38 = vpack.c.bf16 %v681_v25, %v677_v31 }
 0x136   :  { %v684_v33 = vmul.f32 %v676_v24, %v618_v30  ;;  %v687_v39 = vpack.c.bf16 %v683_v28, %v679_v34 }
 0x137   :  { %v686_v36 = vpack.c.bf16 %v682_v29, %v678_v27 }
 0x138   :  { %v688_v35 = vpack.c.bf16 %v684_v33, %v680_v32 }
 0x139   :  { %977 = vmatprep.mubr.bf16.mxu0 %v686_v36 }
 0x13a   :  { %1018 = vmatprep.mubr.bf16.mxu1 %v688_v35  ;;  %978 = vmatmul.mubr.bf16.vlgmr.msra.gmra.mxu0 %v685_v38 }
 0x13b   :  { %1019 = vmatmul.mubr.bf16.vlgmr.msra.gmra.mxu1 %v687_v39 }
 0x1fa   :  { %v1189_v37 = vpop.f32.mrf.mxu0 }
 0x1fb   :  { %v1211_v0 = vpop.f32.mrf.mxu1 }
 0x1fc   :  { %v1190_v40 = vpop.f32.mrf.mxu0 }
 0x1fd   :  { %v1191_v41 = vadd.f32 %v1190_v40, %v1189_v37  ;;  %v1212_v42 = vpop.f32.mrf.mxu1 }
 0x1fe   :  { %v1213_v43 = vadd.f32 %v1212_v42, %v1211_v0  ;;  %v1192_v44 = vpop.f32.mrf.mxu0 }
 0x1ff   :  { %v1214_v45 = vpop.f32.mrf.mxu1 }
 0x200   :  { %v1021_v46 = vadd.f32 %v1213_v43, %v1191_v41  ;;  %v1193_v47 = vpop.f32.mrf.mxu0 }
 0x201   :  { %v1194_v48 = vadd.f32 %v1193_v47, %v1192_v44  ;;  %v1215_v49 = vpop.f32.mrf.mxu1 }
 0x202   :  { %1048 = vst [vmem:[#allocation9] sm:$0xff] %v1021_v46  ;;  %v1216_v50 = vadd.f32 %v1215_v49, %v1214_v45 }
 0x204   :  { %v1024_v51 = vadd.f32 %v1216_v50, %v1194_v48 }
 0x206   :  { %1049 = vst [vmem:[#allocation9 + $0x8] sm:$0xff] %v1024_v51 }
 0x207   :  { %1364 = shalt.err (!%p1361_p5)
}
 0x208   :  { %s1388_s4 = smov 128   ;;  %s1389_s5 = smov 8  }
 0x209   :  { %1061 = dma.vmem_to_hbm [thread:$0]  %s1056_s2, 256, %s1443_s3, [#allocation5], %s1388_s4, %s1388_s4, %s1389_s5  }
 0x20a   :  { %1377 = dma.done.wait [#allocation5], 256  }
 0x20b   :  { %1378 = vsyncadd [#allocation5], 4294967040 }
 0x20c   :  { %1065 = vsyncpa [#allocation4], 1 }
 0x20d   :  { %1066 = vsyncpa [#allocation7], 1 }
 0x20e   :  { %1067 = vsyncpa [#allocation5], 1 }

</bundles_post_ra>
